<compile_context>
chip_gen: v5e
topology: v5e:2x2
jax: 0.10.0
libtpu: 0.0.40
codegen_flags: <defaults>
</compile_context>

<pallas_src>
import functools

import jax
import jax.numpy as jnp
import numpy as np
from jax import lax
from jax.experimental import pallas as pl
from jax.experimental.pallas import tpu as pltpu

# ----------------------------- stem constants --------------------------------
KH = 7
KW = 7
STRIDE = 2
PAD = 3
C_IN = 3
C_OUT = 64
EPS = 1e-5

K_TAP = 24                 # KW * C_IN = 21, padded to a sublane multiple (zeros)
K_USED = KH * K_TAP        # 168
K_PAD = 256                # aligned MXU contraction depth (assembled in VMEM only)
N_PAD = 128                # lane-dense output width (64 real channels + zero lanes)


def _round_up(x, m):
    return (x + m - 1) // m * m


# ----------------------------- Pallas kernel ---------------------------------


def _stem_kernel(z_ref, w_ref, b_ref, o_ref, p_ref):
    """Fused 7x7 / stride-2 conv (BN folded) + bias + ReLU for one (batch, row-block).

    z_ref: (1, 1, 2*(t_oh+3), OW, K_TAP) bf16  column-im2col'd input rows, parity-major
    w_ref: (K_PAD, N_PAD)                bf16  folded conv weights (resident)
    b_ref: (1, N_PAD)                    f32   folded BN bias (resident)
    o_ref: (1, t_oh, OW, N_PAD)          bf16  NHWC output tile (lane-dense)
    p_ref: (t_oh*OW, K_PAD)              bf16  VMEM patch-assembly scratch
    """
    _, t_oh, ow, n_pad = o_ref.shape
    k_tap = z_ref.shape[-1]
    half = z_ref.shape[2] // 2           # = t_oh + 3 (rows per parity)
    m_t = t_oh * ow

    # In-VMEM patch assembly: the kernel-row (H-direction) duplication happens here,
    # never through HBM. All slice starts are static (parity-major packed rows).
    for i in range(KH):                                  # 7 kernel rows, static unroll
        base = (i % 2) * half + i // 2
        strip = z_ref[0, 0, base:base + t_oh, :, :]      # (t_oh, OW, K_TAP)
        p_ref[:, i * k_tap:(i + 1) * k_tap] = strip.reshape(m_t, k_tap)
    # Zero the contraction padding so stale VMEM (possibly NaN) can't leak into the MXU.
    p_ref[:, KH * k_tap:] = jnp.zeros((m_t, p_ref.shape[1] - KH * k_tap), jnp.bfloat16)

    acc = jnp.dot(p_ref[...], w_ref[...], preferred_element_type=jnp.float32)
    acc = jnp.maximum(acc + b_ref[...], 0.0)
    o_ref[...] = acc.astype(o_ref.dtype).reshape(1, t_oh, ow, n_pad)


def _fused_stem(z_blk, w_mat, bias_row, *, t_oh):
    B, n_rb, q2, ow, k_tap = z_blk.shape
    k_pad, n_pad = w_mat.shape
    return pl.pallas_call(
        _stem_kernel,
        out_shape=jax.ShapeDtypeStruct((B, n_rb * t_oh, ow, n_pad), jnp.bfloat16),
        grid_spec=pltpu.PrefetchScalarGridSpec(
            num_scalar_prefetch=0,
            grid=(B, n_rb),
            in_specs=[
                pl.BlockSpec((1, 1, q2, ow, k_tap), lambda b, r: (b, r, 0, 0, 0)),
                pl.BlockSpec((k_pad, n_pad), lambda b, r: (0, 0)),   # weights (resident)
                pl.BlockSpec((1, n_pad), lambda b, r: (0, 0)),       # folded BN bias
            ],
            out_specs=pl.BlockSpec((1, t_oh, ow, n_pad), lambda b, r: (b, r, 0, 0)),
            scratch_shapes=[pltpu.VMEM((t_oh * ow, k_pad), jnp.bfloat16)],
        ),
        compiler_params=pltpu.CompilerParams(
            dimension_semantics=("parallel", "parallel"),
        ),
    )(z_blk, w_mat, bias_row)


# ------------------------------- JAX glue -------------------------------------


def _choose_row_tile(oh, ow):
    """Small images: one block per image (v5e/v6e single-TC: grid is a serial loop).
    Large images: ~2048 patch rows per block (measured mem-bound sweet spot), which
    also yields >= 2 row blocks so v7x's two TensorCores both get work."""
    if oh * ow <= 4096:
        return oh
    return max(8, min(oh, (2048 // max(ow, 1)) // 8 * 8))


class ModelExtractorPallas:
    """resnet18 children[:3]: conv1 -> bn1 (eval) -> relu; fix_weights=True (frozen)."""

    def __init__(self, key):
        k_w, k_g, k_b, k_m, k_v = jax.random.split(key, 5)
        fan_in = C_IN * KH * KW
        # Deterministic in-script init (torchvision pretrained weights not loadable here).
        self.conv_w = jax.random.normal(
            k_w, (C_OUT, C_IN, KH, KW), jnp.float32) / np.sqrt(fan_in)
        self.bn_gamma = 1.0 + 0.1 * jax.random.normal(k_g, (C_OUT,), jnp.float32)
        self.bn_beta = 0.1 * jax.random.normal(k_b, (C_OUT,), jnp.float32)
        self.bn_mean = 0.1 * jax.random.normal(k_m, (C_OUT,), jnp.float32)
        self.bn_var = 0.5 + jnp.abs(jax.random.normal(k_v, (C_OUT,), jnp.float32))

        # --- one-time constant folding (weights frozen: fix_weights=True) -----------
        scale = self.bn_gamma / jnp.sqrt(self.bn_var + EPS)                  # (Cout,)
        w_f = self.conv_w * scale[:, None, None, None]                       # (64,3,7,7)
        # weight row index k = i*K_TAP + (j*C_IN + c) to match the in-kernel assembly
        w_rows = jnp.transpose(w_f, (2, 3, 1, 0)).reshape(KH, KW * C_IN, C_OUT)
        w_rows = jnp.pad(w_rows, ((0, 0), (0, K_TAP - KW * C_IN), (0, 0)))   # (7,24,64)
        w_mat = w_rows.reshape(KH * K_TAP, C_OUT)
        w_mat = jnp.pad(w_mat, ((0, K_PAD - KH * K_TAP), (0, N_PAD - C_OUT)))
        self.w_mat = w_mat.astype(jnp.bfloat16)                              # (256,128)
        bias = self.bn_beta - self.bn_mean * scale
        self.bias_row = jnp.pad(bias, (0, N_PAD - C_OUT)).reshape(1, N_PAD)  # f32

    @functools.partial(jax.jit, static_argnums=(0,), static_argnames=("channels_last",))
    def __call__(self, x_nchw, channels_last=False):
        B, C, H, W = x_nchw.shape
        assert C == C_IN
        oh = (H + 2 * PAD - KH) // STRIDE + 1
        ow = (W + 2 * PAD - KW) // STRIDE + 1
        hp = H + 2 * PAD

        # --- glue (input-sized, bf16): NHWC pad + kernel-column (W) im2col ----------
        x = jnp.transpose(x_nchw, (0, 2, 3, 1)).astype(jnp.bfloat16)
        x = jnp.pad(x, ((0, 0), (PAD, PAD), (PAD, PAD), (0, 0)))
        cols = [x[:, :, j:j + STRIDE * (ow - 1) + 1:STRIDE, :] for j in range(KW)]
        z = jnp.stack(cols, axis=3).reshape(B, hp, ow, KW * C_IN)            # (B,Hp,OW,21)
        z = jnp.pad(z, ((0, 0), (0, 0), (0, 0), (0, K_TAP - KW * C_IN)))     # K stays 24 in HBM

        # --- overlapping parity row blocks so the in-kernel row gather is static ----
        t_oh = _choose_row_tile(oh, ow)
        n_rb = -(-oh // t_oh)
        extra = (KH - 1) // STRIDE                                           # 3
        rr = np.arange(n_rb)[:, None, None]
        pp = np.arange(2)[None, :, None]
        tt = np.arange(t_oh + extra)[None, None, :]
        rows = STRIDE * (rr * t_oh + tt) + pp                                # h = 2*h2 + parity
        rows = np.minimum(rows, hp - 1).reshape(n_rb, -1)
        z_blk = z[:, rows]                              # (B, n_rb, 2*(t_oh+3), OW, K_TAP)

        # --- hot path in Pallas ------------------------------------------------------
        out = _fused_stem(z_blk, self.w_mat, self.bias_row, t_oh=t_oh)       # bf16 NHWC(128)

        # --- strip padding; layout/dtype handling -----------------------------------
        out = out[:, :oh, :, :C_OUT]                                         # (B,OH,OW,64) bf16
        if channels_last:
            return out                       # fast path: NHWC bf16, no transpose
        # default: faithful to the torch module (NCHW, float32)
        return jnp.transpose(out, (0, 3, 1, 2)).astype(jnp.float32)


# -------------------------------- References ----------------------------------


def _reference_f32(model, x_nchw):
    """True module semantics: f32 conv -> eval BatchNorm -> ReLU."""
    y = lax.conv_general_dilated(
        x_nchw, model.conv_w,
        window_strides=(STRIDE, STRIDE),
        padding=((PAD, PAD), (PAD, PAD)),
        dimension_numbers=("NCHW", "OIHW", "NCHW"),
        precision=lax.Precision.HIGHEST,
    )
    scale = model.bn_gamma / jnp.sqrt(model.bn_var + EPS)
    bias = model.bn_beta - model.bn_mean * scale
    y = y * scale[None, :, None, None] + bias[None, :, None, None]
    return jnp.maximum(y, 0.0)


def _reference_bf16(model, x_nchw):
    """Same math at the kernel's operand precision (bf16 operands, f32 accumulate)."""
    scale = model.bn_gamma / jnp.sqrt(model.bn_var + EPS)
    bias = model.bn_beta - model.bn_mean * scale
    w_folded = (model.conv_w * scale[:, None, None, None]).astype(jnp.bfloat16)
    y = lax.conv_general_dilated(
        x_nchw.astype(jnp.bfloat16).astype(jnp.float32),
        w_folded.astype(jnp.float32),
        window_strides=(STRIDE, STRIDE),
        padding=((PAD, PAD), (PAD, PAD)),
        dimension_numbers=("NCHW", "OIHW", "NCHW"),
        precision=lax.Precision.HIGHEST,
    )
    y = y + bias[None, :, None, None]
    return jnp.maximum(y, 0.0)


# ---------------------------------- Main ---------------------------------------

if __name__ == "__main__":
    key = jax.random.PRNGKey(0)
    k_param, k_x = jax.random.split(key)

    model = ModelExtractorPallas(k_param)

    # input: (batch=2, channels=3, spatial=16x16) NCHW (the ResNet stem takes 3 channels)
    x = jax.random.normal(k_x, (2, 3, 16, 16), jnp.float32)

    out = jax.block_until_ready(model(x))
    assert out.shape == (2, 64, 8, 8) and out.dtype == jnp.float32

    # Logic check at matching operand precision (bf16 operands + bf16 output rounding).
    ref_q = jax.block_until_ready(_reference_bf16(model, x))
    np.testing.assert_allclose(np.asarray(out), np.asarray(ref_q), rtol=1e-2, atol=1e-2)

    # True module semantics (full f32 reference); loose tol covers bf16 rounding.
    ref = jax.block_until_ready(_reference_f32(model, x))
    np.testing.assert_allclose(np.asarray(out), np.asarray(ref), rtol=4e-2, atol=4e-2)

    print("KERNEL_OK")
</pallas_src>

<mosaic_0001>
module attributes {stable_mosaic.version = 11 : i64} {
  func.func @_stem_kernel(%arg0: i32, %arg1: i32, %arg2: memref<1x1x22x8x24xbf16, #tpu.memory_space<vmem>>, %arg3: memref<256x128xbf16, #tpu.memory_space<vmem>>, %arg4: memref<1x128xf32, #tpu.memory_space<vmem>>, %arg5: memref<1x8x8x128xbf16, #tpu.memory_space<vmem>>, %arg6: memref<64x256xbf16, #tpu.memory_space<vmem>>) attributes {dimension_semantics = [#tpu.dimension_semantics<parallel>, #tpu.dimension_semantics<parallel>], iteration_bounds = array<i64: 2, 1>, scalar_prefetch = 0 : i64, scratch_operands = 1 : i64, tpu.core_type = #tpu.core_type<tc>, window_params = [{transform_indices = @transform_0, window_bounds = array<i64: 1, 1, 22, 8, 24>}, {pipeline_mode = #tpu.pipeline_mode<synchronous>, transform_indices = @transform_1, window_bounds = array<i64: 256, 128>}, {pipeline_mode = #tpu.pipeline_mode<synchronous>, transform_indices = @transform_2, window_bounds = array<i64: 1, 128>}, {transform_indices = @transform_3, window_bounds = array<i64: 1, 8, 8, 128>}]} {
    %c0 = arith.constant 0 : index
    %c0_0 = arith.constant 0 : index
    %c0_1 = arith.constant 0 : index
    %c0_2 = arith.constant 0 : index
    %c0_3 = arith.constant 0 : index
    %0 = vector.load %arg2[%c0, %c0_0, %c0_1, %c0_2, %c0_3] : memref<1x1x22x8x24xbf16, #tpu.memory_space<vmem>>, vector<1x1x8x8x24xbf16>
    %1 = vector.shape_cast %0 : vector<1x1x8x8x24xbf16> to vector<8x8x24xbf16>
    %2 = vector.shape_cast %1 : vector<8x8x24xbf16> to vector<64x24xbf16>
    %c0_4 = arith.constant 0 : index
    %c0_5 = arith.constant 0 : index
    %3 = vector.load %arg6[%c0_4, %c0_5] : memref<64x256xbf16, #tpu.memory_space<vmem>>, vector<64x24xbf16>
    tpu.vector_store %arg6[%c0_4, %c0_5], %2 {strides = array<i32>} : memref<64x256xbf16, #tpu.memory_space<vmem>>, vector<64x24xbf16>,
    %c0_6 = arith.constant 0 : index
    %c0_7 = arith.constant 0 : index
    %c11 = arith.constant 11 : index
    %c0_8 = arith.constant 0 : index
    %c0_9 = arith.constant 0 : index
    %4 = vector.load %arg2[%c0_6, %c0_7, %c11, %c0_8, %c0_9] : memref<1x1x22x8x24xbf16, #tpu.memory_space<vmem>>, vector<1x1x8x8x24xbf16>
    %5 = vector.shape_cast %4 : vector<1x1x8x8x24xbf16> to vector<8x8x24xbf16>
    %6 = vector.shape_cast %5 : vector<8x8x24xbf16> to vector<64x24xbf16>
    %c0_10 = arith.constant 0 : index
    %c24 = arith.constant 24 : index
    %7 = vector.load %arg6[%c0_10, %c24] : memref<64x256xbf16, #tpu.memory_space<vmem>>, vector<64x24xbf16>
    tpu.vector_store %arg6[%c0_10, %c24], %6 {strides = array<i32>} : memref<64x256xbf16, #tpu.memory_space<vmem>>, vector<64x24xbf16>,
    %c0_11 = arith.constant 0 : index
    %c0_12 = arith.constant 0 : index
    %c1 = arith.constant 1 : index
    %c0_13 = arith.constant 0 : index
    %c0_14 = arith.constant 0 : index
    %8 = vector.load %arg2[%c0_11, %c0_12, %c1, %c0_13, %c0_14] : memref<1x1x22x8x24xbf16, #tpu.memory_space<vmem>>, vector<1x1x8x8x24xbf16>
    %9 = vector.shape_cast %8 : vector<1x1x8x8x24xbf16> to vector<8x8x24xbf16>
    %10 = vector.shape_cast %9 : vector<8x8x24xbf16> to vector<64x24xbf16>
    %c0_15 = arith.constant 0 : index
    %c48 = arith.constant 48 : index
    %11 = vector.load %arg6[%c0_15, %c48] : memref<64x256xbf16, #tpu.memory_space<vmem>>, vector<64x24xbf16>
    tpu.vector_store %arg6[%c0_15, %c48], %10 {strides = array<i32>} : memref<64x256xbf16, #tpu.memory_space<vmem>>, vector<64x24xbf16>,
    %c0_16 = arith.constant 0 : index
    %c0_17 = arith.constant 0 : index
    %c12 = arith.constant 12 : index
    %c0_18 = arith.constant 0 : index
    %c0_19 = arith.constant 0 : index
    %12 = vector.load %arg2[%c0_16, %c0_17, %c12, %c0_18, %c0_19] : memref<1x1x22x8x24xbf16, #tpu.memory_space<vmem>>, vector<1x1x8x8x24xbf16>
    %13 = vector.shape_cast %12 : vector<1x1x8x8x24xbf16> to vector<8x8x24xbf16>
    %14 = vector.shape_cast %13 : vector<8x8x24xbf16> to vector<64x24xbf16>
    %c0_20 = arith.constant 0 : index
    %c72 = arith.constant 72 : index
    %15 = vector.load %arg6[%c0_20, %c72] : memref<64x256xbf16, #tpu.memory_space<vmem>>, vector<64x24xbf16>
    tpu.vector_store %arg6[%c0_20, %c72], %14 {strides = array<i32>} : memref<64x256xbf16, #tpu.memory_space<vmem>>, vector<64x24xbf16>,
    %c0_21 = arith.constant 0 : index
    %c0_22 = arith.constant 0 : index
    %c2 = arith.constant 2 : index
    %c0_23 = arith.constant 0 : index
    %c0_24 = arith.constant 0 : index
    %16 = vector.load %arg2[%c0_21, %c0_22, %c2, %c0_23, %c0_24] : memref<1x1x22x8x24xbf16, #tpu.memory_space<vmem>>, vector<1x1x8x8x24xbf16>
    %17 = vector.shape_cast %16 : vector<1x1x8x8x24xbf16> to vector<8x8x24xbf16>
    %18 = vector.shape_cast %17 : vector<8x8x24xbf16> to vector<64x24xbf16>
    %c0_25 = arith.constant 0 : index
    %c96 = arith.constant 96 : index
    %19 = vector.load %arg6[%c0_25, %c96] : memref<64x256xbf16, #tpu.memory_space<vmem>>, vector<64x24xbf16>
    tpu.vector_store %arg6[%c0_25, %c96], %18 {strides = array<i32>} : memref<64x256xbf16, #tpu.memory_space<vmem>>, vector<64x24xbf16>,
    %c0_26 = arith.constant 0 : index
    %c0_27 = arith.constant 0 : index
    %c13 = arith.constant 13 : index
    %c0_28 = arith.constant 0 : index
    %c0_29 = arith.constant 0 : index
    %20 = vector.load %arg2[%c0_26, %c0_27, %c13, %c0_28, %c0_29] : memref<1x1x22x8x24xbf16, #tpu.memory_space<vmem>>, vector<1x1x8x8x24xbf16>
    %21 = vector.shape_cast %20 : vector<1x1x8x8x24xbf16> to vector<8x8x24xbf16>
    %22 = vector.shape_cast %21 : vector<8x8x24xbf16> to vector<64x24xbf16>
    %c0_30 = arith.constant 0 : index
    %c120 = arith.constant 120 : index
    %23 = vector.load %arg6[%c0_30, %c120] : memref<64x256xbf16, #tpu.memory_space<vmem>>, vector<64x24xbf16>
    tpu.vector_store %arg6[%c0_30, %c120], %22 {strides = array<i32>} : memref<64x256xbf16, #tpu.memory_space<vmem>>, vector<64x24xbf16>,
    %c0_31 = arith.constant 0 : index
    %c0_32 = arith.constant 0 : index
    %c3 = arith.constant 3 : index
    %c0_33 = arith.constant 0 : index
    %c0_34 = arith.constant 0 : index
    %24 = vector.load %arg2[%c0_31, %c0_32, %c3, %c0_33, %c0_34] : memref<1x1x22x8x24xbf16, #tpu.memory_space<vmem>>, vector<1x1x8x8x24xbf16>
    %25 = vector.shape_cast %24 : vector<1x1x8x8x24xbf16> to vector<8x8x24xbf16>
    %26 = vector.shape_cast %25 : vector<8x8x24xbf16> to vector<64x24xbf16>
    %c0_35 = arith.constant 0 : index
    %c144 = arith.constant 144 : index
    %27 = vector.load %arg6[%c0_35, %c144] : memref<64x256xbf16, #tpu.memory_space<vmem>>, vector<64x24xbf16>
    tpu.vector_store %arg6[%c0_35, %c144], %26 {strides = array<i32>} : memref<64x256xbf16, #tpu.memory_space<vmem>>, vector<64x24xbf16>,
    %cst = arith.constant 0.000000e+00 : bf16
    %28 = vector.broadcast %cst : bf16 to vector<64x88xbf16>
    %c0_36 = arith.constant 0 : index
    %c168 = arith.constant 168 : index
    %29 = vector.load %arg6[%c0_36, %c168] : memref<64x256xbf16, #tpu.memory_space<vmem>>, vector<64x88xbf16>
    tpu.vector_store %arg6[%c0_36, %c168], %28 {strides = array<i32>} : memref<64x256xbf16, #tpu.memory_space<vmem>>, vector<64x88xbf16>,
    %c0_37 = arith.constant 0 : index
    %c0_38 = arith.constant 0 : index
    %30 = vector.load %arg6[%c0_37, %c0_38] : memref<64x256xbf16, #tpu.memory_space<vmem>>, vector<64x256xbf16>
    %c0_39 = arith.constant 0 : index
    %c0_40 = arith.constant 0 : index
    %31 = vector.load %arg3[%c0_39, %c0_40] : memref<256x128xbf16, #tpu.memory_space<vmem>>, vector<256x128xbf16>
    %cst_41 = arith.constant dense<0.000000e+00> : vector<64x128xf32>
    %32 = tpu.matmul %30, %31, %cst_41 {dimension_numbers = #tpu.dot_dimension_numbers<[1], [0], [0], [1], [0, 0, 1, 1], [], []>} : vector<64x256xbf16>, vector<256x128xbf16>, vector<64x128xf32> -> vector<64x128xf32>
    %c0_42 = arith.constant 0 : index
    %c0_43 = arith.constant 0 : index
    %33 = vector.load %arg4[%c0_42, %c0_43] : memref<1x128xf32, #tpu.memory_space<vmem>>, vector<1x128xf32>
    %34 = vector.broadcast %33 : vector<1x128xf32> to vector<64x128xf32>
    %35 = arith.addf %32, %34 : vector<64x128xf32>
    %cst_44 = arith.constant 0.000000e+00 : f32
    %36 = vector.broadcast %cst_44 : f32 to vector<64x128xf32>
    %37 = arith.maximumf %35, %36 : vector<64x128xf32>
    %38 = arith.truncf %37 : vector<64x128xf32> to vector<64x128xbf16>
    %39 = vector.shape_cast %38 : vector<64x128xbf16> to vector<1x8x8x128xbf16>
    %c0_45 = arith.constant 0 : index
    %c0_46 = arith.constant 0 : index
    %c0_47 = arith.constant 0 : index
    %c0_48 = arith.constant 0 : index
    %40 = vector.load %arg5[%c0_45, %c0_46, %c0_47, %c0_48] : memref<1x8x8x128xbf16, #tpu.memory_space<vmem>>, vector<1x8x8x128xbf16>
    tpu.vector_store %arg5[%c0_45, %c0_46, %c0_47, %c0_48], %39 {strides = array<i32>} : memref<1x8x8x128xbf16, #tpu.memory_space<vmem>>, vector<1x8x8x128xbf16>,
    return
  }
  func.func @transform_0(%arg0: i32, %arg1: i32) -> (i32, i32, i32, i32, i32) {
    %c0_i32 = arith.constant 0 : i32
    %c0_i32_0 = arith.constant 0 : i32
    %c0_i32_1 = arith.constant 0 : i32
    %c0_i32_2 = arith.constant 0 : i32
    return %arg0, %arg1, %c0_i32, %c0_i32_0, %c0_i32_1 : i32, i32, i32, i32, i32
  }
  func.func @transform_1(%arg0: i32, %arg1: i32) -> (i32, i32) {
    %c0_i32 = arith.constant 0 : i32
    %c0_i32_0 = arith.constant 0 : i32
    %c0_i32_1 = arith.constant 0 : i32
    return %c0_i32, %c0_i32_0 : i32, i32
  }
  func.func @transform_2(%arg0: i32, %arg1: i32) -> (i32, i32) {
    %c0_i32 = arith.constant 0 : i32
    %c0_i32_0 = arith.constant 0 : i32
    %c0_i32_1 = arith.constant 0 : i32
    return %c0_i32, %c0_i32_0 : i32, i32
  }
  func.func @transform_3(%arg0: i32, %arg1: i32) -> (i32, i32, i32, i32) {
    %c0_i32 = arith.constant 0 : i32
    %c0_i32_0 = arith.constant 0 : i32
    %c0_i32_1 = arith.constant 0 : i32
    return %arg0, %arg1, %c0_i32, %c0_i32_0 : i32, i32, i32, i32
  }
}

</mosaic_0001>

<bundles_post_ra>
// kernel: a_call__.1
= control target key start
LH: loop header
LB: loop body
LE: loop exit
PB: predicated region body
PF: predicated region fallthrough
CT: control target
= control target key end

     0   :  { %s1208_s12 = smov 0   ;;  %s1210_s13 = smov 0   ;;  %s1508_s0 = inlined_call_operand.vmem [shape: bf16[2,1,22,8,24], index: 0, kind: input, shape index: {}]   ;;  %s1509_s1 = inlined_call_operand.vmem [shape: bf16[256,128], index: 1, kind: input, shape index: {}]   ;;  %s1510_s2 = inlined_call_operand.vmem [shape: f32[1,128], index: 2, kind: input, shape index: {}]   ;;  %s1511_s3 = inlined_call_operand.vmem [shape: bf16[2,8,8,128], index: 3, kind: output, shape index: {}]  }
   0x1   :  { %s1212_s14 = smov 0  }
   0x2 LB: > { %s25_s15 = sadd.s32 1, %s1175_s13  ;;  %p910_p0 = scmp.ge.s32.totalorder %s1179_s14, 1  ;;  %s1179_s14 = sphi %s1212_s14, %s13_s14   ;;  %s1175_s13 = sphi %s1210_s13, %s1515_s13   ;;  %s1171_s12 = sphi %s1208_s12, %s1514_s12  }
   0x3   : > { %p27_p1 = scmp.ge.s32.totalorder %s25_s15, 2  ;;  %p157_p2 = scmp.lt.s32.totalorder %s1179_s14, 3 }
   0x5   : > { %s1517_s15 = smov (%p27_p1, %s25_s15), 0  ;;  %p158_p3 = pnand %p910_p0, %p157_p2 }
   0x6   : > { %p189_p4 = scmp.lt.s32.totalorder (!%p158_p3), %s1171_s12, 1  ;;  %s1181_s20 = smov (!%p158_p3), 48  }
   0x7   : > { %161 = sbr.rel (%p158_p3) target bundleno = 408 (0x198), region = 32  ;;  %s1182_s21 = smov (!%p158_p3), 24  }
   0x8   : > { %s1183_s22 = smov (!%p158_p3), 120   ;;  %s1184_s23 = smov (!%p158_p3), 72  }
   0x9   : > { %s1185_s24 = smov (!%p158_p3), 96   ;;  %s1186_s25 = smov (!%p158_p3), 16  }
   0xc   : > { %s1519_s12 = smov (!%p189_p4, %s1171_s12), 1  ;;  %vm217_vm0 = vcmask 191488   ;;  %v1076_v34 = vld [vmem:[%s1509_s1 + $0x38] sm:$0xff]  ;;  %v1075_v40 = vld [vmem:[%s1509_s1 + $0x30] sm:$0xff]  ;;  %v1074_v42 = vld [vmem:[%s1509_s1 + $0x28] sm:$0xff]  ;;  %vm267_vm1 = vcmask 388288  }
   0xd   : > { %s1124_s16 = smul.u32 88, %s1519_s12  ;;  %1108 = vmatpush.bf16.msra.mxu2 %v1076_v34  ;;  %734 = vmatpush.bf16.msra.mxu0 %v1076_v34  ;;  %v1084_v38 = vld [vmem:[%s1509_s1 + $0x78] sm:$0xff]  ;;  %v1083_v41 = vld [vmem:[%s1509_s1 + $0x70] sm:$0xff]  ;;  %v1082_v46 = vld [vmem:[%s1509_s1 + $0x68] sm:$0xff]  ;;  %vm317_vm2 = vcmask 585088   ;;  %vm484_vm3 = vcmask 1044416  }
   0xe   : > { %1116 = vmatpush.bf16.msra.mxu3 %v1084_v38  ;;  %763 = vmatpush.bf16.msra.mxu1 %v1084_v38  ;;  %v1073_v48 = vld [vmem:[%s1509_s1 + $0x20] sm:$0xff]  ;;  %v1072_v53 = vld [vmem:[%s1509_s1 + $0x18] sm:$0xff]  ;;  %v1071_v56 = vld [vmem:[%s1509_s1 + $0x10] sm:$0xff]  ;;  %vm485_vm4 = vcmask 130052   ;;  %vm367_vm5 = vcmask 781888   ;;  %vm467_vm6 = vcmask 982016  }
   0xf   : > { %s1232_s19 = scalar_lea.vmem %s1508_s0, %s1124_s16  ;;  %v1081_v50 = vld [vmem:[%s1509_s1 + $0x60] sm:$0xff]  ;;  %v1080_v54 = vld [vmem:[%s1509_s1 + $0x58] sm:$0xff]  ;;  %v1079_v60 = vld [vmem:[%s1509_s1 + $0x50] sm:$0xff]  ;;  %vm417_vm7 = vcmask 978688   ;;  %vm536_vm9 = vcmask 322688   ;;  %vm545_vm10 = vcmask 1043776  }
  0x10   : > { %v926_v0 = vld [vmem:[%s1232_s19 + $0x14] sm:$0xf]  ;;  %v918_v1 = vld [vmem:[%s1232_s19 + $0x3c] sm:$0xf]  ;;  %v950_v2 = vld [vmem:[%s1232_s19 + $0x44] sm:$0xf] }
  0x11   : > { %301 = vrot.lane.b32.xlu1 %v926_v0, %s1181_s20  ;;  %251 = vrot.lane.b32.xlu0 %v918_v1, %s1182_s21  ;;  %v927_v3 = vld [vmem:[%s1232_s19 + $0x18] sm:$0xf]  ;;  %v919_v4 = vld [vmem:[%s1232_s19 + $0x40] sm:$0xf]  ;;  %vm1396_vm8 = vmor %vm485_vm4, %vm484_vm3 }
  0x12   : > { %451 = vrot.lane.b32.xlu2 %v950_v2, %s1183_s22  ;;  %v951_v5 = vld [vmem:[%s1232_s19 + $0x48] sm:$0xf]  ;;  %v935_v6 = vld [vmem:[%s1232_s19 + $0x44] sm:$0xf]  ;;  %v934_v7 = vld [vmem:[%s1232_s19 + $0x40] sm:$0xf]  ;;  %1109 = vmatpush.bf16.msra.mxu2 %v1075_v40 }
  0x13   : > { %v942_v8 = vld [vmem:[%s1232_s19 + $0x18] sm:$0xf]  ;;  %v958_v9 = vld [vmem:[%s1232_s19 + $0x1c] sm:$0xf]  ;;  %v959_v11 = vld [vmem:[%s1232_s19 + $0x20] sm:$0xf]  ;;  %735 = vmatpush.bf16.msra.mxu0 %v1075_v40  ;;  %1117 = vmatpush.bf16.msra.mxu3 %v1083_v41 }
  0x14   : > { %v943_v10 = vld [vmem:[%s1232_s19 + $0x1c] sm:$0xf]  ;;  %v915_v12 = vld [vmem:[%s1232_s19 + $0x30] sm:$0xf]  ;;  %v914_v13 = vld [vmem:[%s1232_s19 + $0x2c] sm:$0xf]  ;;  %764 = vmatpush.bf16.msra.mxu1 %v1083_v41 }
  0x15   : > { %v922_v14 = vld [vmem:[%s1232_s19 + $0x4] sm:$0xf]  ;;  %v946_v15 = vld [vmem:[%s1232_s19 + $0x34] sm:$0xf]  ;;  %v923_v16 = vld [vmem:[%s1232_s19 + $0x8] sm:$0xf] }
  0x16   : > { %v947_v17 = vld [vmem:[%s1232_s19 + $0x38] sm:$0xf]  ;;  %v931_v18 = vld [vmem:[%s1232_s19 + $0x34] sm:$0xf]  ;;  %v930_v19 = vld [vmem:[%s1232_s19 + $0x30] sm:$0xf]  ;;  %1110 = vmatpush.bf16.msra.mxu2 %v1074_v42 }
  0x17   : > { %v938_v20 = vld [vmem:[%s1232_s19 + $0x8] sm:$0xf]  ;;  %v954_v21 = vld [vmem:[%s1232_s19 + $0xc] sm:$0xf]  ;;  %v955_v23 = vld [vmem:[%s1232_s19 + $0x10] sm:$0xf]  ;;  %736 = vmatpush.bf16.msra.mxu0 %v1074_v42  ;;  %1118 = vmatpush.bf16.msra.mxu3 %v1082_v46 }
  0x18   : > { %v939_v22 = vld [vmem:[%s1232_s19 + $0xc] sm:$0xf]  ;;  %v921_v24 = vld [vmem:[%s1232_s19 + $0x48] sm:$0xf]  ;;  %v920_v25 = vld [vmem:[%s1232_s19 + $0x44] sm:$0xf]  ;;  %765 = vmatpush.bf16.msra.mxu1 %v1082_v46 }
  0x19   : > { %303 = vrot.lane.b32.xlu1 %v927_v3, %s1181_s20  ;;  %253 = vrot.lane.b32.xlu0 %v919_v4, %s1182_s21  ;;  %v928_v26 = vld [vmem:[%s1232_s19 + $0x1c] sm:$0xf]  ;;  %v952_v27 = vld [vmem:[%s1232_s19 + $0x4c] sm:$0xf] }
  0x1a   : > { %453 = vrot.lane.b32.xlu2 %v951_v5, %s1183_s22  ;;  %v929_v28 = vld [vmem:[%s1232_s19 + $0x20] sm:$0xf]  ;;  %v953_v29 = vld [vmem:[%s1232_s19 + $0x50] sm:$0xf]  ;;  %v937_v30 = vld [vmem:[%s1232_s19 + $0x4c] sm:$0xf]  ;;  %1111 = vmatpush.bf16.msra.mxu2 %v1073_v48 }
  0x1b   : > { %v936_v31 = vld [vmem:[%s1232_s19 + $0x48] sm:$0xf]  ;;  %v944_v32 = vld [vmem:[%s1232_s19 + $0x20] sm:$0xf]  ;;  %v213_v33 = vld [vmem:[%s1232_s19 + $0x10] sm:$0xf]  ;;  %737 = vmatpush.bf16.msra.mxu0 %v1073_v48  ;;  %1119 = vmatpush.bf16.msra.mxu3 %v1081_v50 }
  0x1c   : > { %222 = vst.msk [vmem:[#allocation2 + $0x20] sm:$0xf] %vm217_vm0, %v213_v33  ;;  %v960_v35 = vld [vmem:[%s1232_s19 + $0x24] sm:$0xf]  ;;  %v961_v37 = vld [vmem:[%s1232_s19 + $0x28] sm:$0xf]  ;;  %766 = vmatpush.bf16.msra.mxu1 %v1081_v50 }
  0x1d   : > { %v945_v36 = vld [vmem:[%s1232_s19 + $0x24] sm:$0xf]  ;;  %v214_v39 = vld [vmem:[%s1232_s19 + $0x14] sm:$0xf]  ;;  %v917_v44 = vld [vmem:[%s1232_s19 + $0x38] sm:$0xf] }
  0x1e   : > { %223 = vst.msk [vmem:[#allocation2 + $0x28] sm:$0xf] %vm217_vm0, %v214_v39  ;;  %v916_v45 = vld [vmem:[%s1232_s19 + $0x34] sm:$0xf]  ;;  %v924_v47 = vld [vmem:[%s1232_s19 + $0xc] sm:$0xf]  ;;  %1112 = vmatpush.bf16.msra.mxu2 %v1072_v53 }
  0x1f   : > { %v948_v51 = vld [vmem:[%s1232_s19 + $0x3c] sm:$0xf]  ;;  %v925_v52 = vld [vmem:[%s1232_s19 + $0x10] sm:$0xf]  ;;  %v949_v55 = vld [vmem:[%s1232_s19 + $0x40] sm:$0xf]  ;;  %738 = vmatpush.bf16.msra.mxu0 %v1072_v53  ;;  %1120 = vmatpush.bf16.msra.mxu3 %v1080_v54 }
  0x20   : > { %767 = vmatpush.bf16.msra.mxu1 %v1080_v54  ;;  %v932_v58 = vld [vmem:[%s1232_s19 + $0x38] sm:$0xf]  ;;  %v933_v59 = vld [vmem:[%s1232_s19 + $0x3c] sm:$0xf]  ;;  %v940_v61 = vld [vmem:[%s1232_s19 + $0x10] sm:$0xf] }
  0x21   : > { %353 = vrot.lane.b32.xlu1 %v935_v6, %s1184_s23  ;;  %351 = vrot.lane.b32.xlu0 %v934_v7, %s1184_s23  ;;  %v1070_v62 = vld [vmem:[%s1509_s1 + $0x8] sm:$0xff]  ;;  %v210_v2 = vld [vmem:[%s1232_s19 + $0x4] sm:$0xf] }
  0x22   : > { %401 = vrot.lane.b32.xlu2 %v942_v8, %s1185_s24  ;;  %1113 = vmatpush.bf16.msra.mxu2 %v1071_v56  ;;  %v1078_v63 = vld [vmem:[%s1509_s1 + $0x48] sm:$0xff]  ;;  %v209_v3 = vld [vmem:[%s1232_s19] sm:$0xf]  ;;  %v941_v5 = vld [vmem:[%s1232_s19 + $0x14] sm:$0xf] }
  0x23   : > { %739 = vmatpush.bf16.msra.mxu0 %v1071_v56  ;;  %1121 = vmatpush.bf16.msra.mxu3 %v1079_v60  ;;  %v1069_v4 = vld [vmem:[%s1509_s1] sm:$0xff]  ;;  %v956_v7 = vld [vmem:[%s1232_s19 + $0x14] sm:$0xf]  ;;  %219 = vst.msk [vmem:[#allocation2 + $0x8] sm:$0xf] %vm217_vm0, %v210_v2 }
  0x24   : > { %768 = vmatpush.bf16.msra.mxu1 %v1079_v60  ;;  %v1077_v8 = vld [vmem:[%s1509_s1 + $0x40] sm:$0xff]  ;;  %218 = vst.msk [vmem:[#allocation2] sm:$0xf] %vm217_vm0, %v209_v3  ;;  %v212_v50 = vld [vmem:[%s1232_s19 + $0xc] sm:$0xf] }
  0x25   : > { %221 = vst.msk [vmem:[#allocation2 + $0x18] sm:$0xf] %vm217_vm0, %v212_v50 }
  0x26   : > { %1114 = vmatpush.bf16.msra.mxu2 %v1070_v62 }
  0x27   : > { %740 = vmatpush.bf16.msra.mxu0 %v1070_v62  ;;  %1122 = vmatpush.bf16.msra.mxu3 %v1078_v63 }
  0x28   : > { %769 = vmatpush.bf16.msra.mxu1 %v1078_v63 }
  0x29   : > { %520 = vrot.lane.b32.xlu1 %v958_v9, %s1186_s25  ;;  %403 = vrot.lane.b32.xlu0 %v943_v10, %s1185_s24  ;;  %v957_v9 = vld [vmem:[%s1232_s19 + $0x18] sm:$0xf] }
  0x2a   : > { %522 = vrot.lane.b32.xlu2 %v959_v11, %s1186_s25  ;;  %1115 = vmatpush.bf16.msra.mxu2 %v1069_v4 }
  0x2b   : > { %741 = vmatpush.bf16.msra.mxu0 %v1069_v4  ;;  %1123 = vmatpush.bf16.msra.mxu3 %v1077_v8 }
  0x2c   : > { %770 = vmatpush.bf16.msra.mxu1 %v1077_v8 }
  0x31   : > { %245 = vrot.lane.b32.xlu1 %v915_v12, %s1182_s21  ;;  %243 = vrot.lane.b32.xlu0 %v914_v13, %s1182_s21 }
  0x32   : > { %293 = vrot.lane.b32.xlu2 %v922_v14, %s1181_s20 }
  0x39   : > { %443 = vrot.lane.b32.xlu1 %v946_v15, %s1183_s22  ;;  %295 = vrot.lane.b32.xlu0 %v923_v16, %s1181_s20 }
  0x3a   : > { %445 = vrot.lane.b32.xlu2 %v947_v17, %s1183_s22 }
  0x41   : > { %345 = vrot.lane.b32.xlu1 %v931_v18, %s1184_s23  ;;  %343 = vrot.lane.b32.xlu0 %v930_v19, %s1184_s23 }
  0x42   : > { %393 = vrot.lane.b32.xlu2 %v938_v20, %s1185_s24 }
  0x49   : > { %512 = vrot.lane.b32.xlu1 %v954_v21, %s1186_s25  ;;  %395 = vrot.lane.b32.xlu0 %v939_v22, %s1185_s24  ;;  %v1187_v22 = vmov 0  }
  0x4a   : > { %514 = vrot.lane.b32.xlu2 %v955_v23, %s1186_s25 }
  0x51   : > { %257 = vrot.lane.b32.xlu1 %v921_v24, %s1182_s21  ;;  %255 = vrot.lane.b32.xlu0 %v920_v25, %s1182_s21 }
  0x52   : > { %305 = vrot.lane.b32.xlu2 %v928_v26, %s1181_s20 }
  0x59   : > { %455 = vrot.lane.b32.xlu1 %v952_v27, %s1183_s22  ;;  %307 = vrot.lane.b32.xlu0 %v929_v28, %s1181_s20  ;;  %v216_v27 = vld [vmem:[%s1232_s19 + $0x1c] sm:$0xf] }
  0x5a   : > { %457 = vrot.lane.b32.xlu2 %v953_v29, %s1183_s22  ;;  %v215_v29 = vld [vmem:[%s1232_s19 + $0x18] sm:$0xf]  ;;  %225 = vst.msk [vmem:[#allocation2 + $0x38] sm:$0xf] %vm217_vm0, %v216_v27 }
  0x5b   : > { %224 = vst.msk [vmem:[#allocation2 + $0x30] sm:$0xf] %vm217_vm0, %v215_v29 }
  0x61   : > { %357 = vrot.lane.b32.xlu1 %v937_v30, %s1184_s23  ;;  %355 = vrot.lane.b32.xlu0 %v936_v31, %s1184_s23 }
  0x62   : > { %405 = vrot.lane.b32.xlu2 %v944_v32, %s1185_s24 }
  0x69   : > { %524 = vrot.lane.b32.xlu1 %v960_v35, %s1186_s25  ;;  %407 = vrot.lane.b32.xlu0 %v945_v36, %s1185_s24 }
  0x6a   : > { %526 = vrot.lane.b32.xlu2 %v961_v37, %s1186_s25 }
  0x6c   : > { %v1325_v43 = vpop.permute.xlu2 %451 }
  0x6d   : > { %v463_v13 = vrot.slane %v1325_v43, 4 }
  0x6f   : > { %v472_v17 = vsel %vm467_vm6, %v463_v13, %v1325_v43 }
  0x71   : > { %249 = vrot.lane.b32.xlu1 %v917_v44, %s1182_s21  ;;  %247 = vrot.lane.b32.xlu0 %v916_v45, %s1182_s21 }
  0x72   : > { %297 = vrot.lane.b32.xlu2 %v924_v47, %s1181_s20 }
  0x74   : > { %v1339_v49 = vpop.permute.xlu2 %453 }
  0x75   : > { %v464_v19 = vrot.slane %v1339_v49, 4 }
  0x77   : > { %v473_v23 = vsel %vm467_vm6, %v464_v19, %v1339_v49 }
  0x79   : > { %447 = vrot.lane.b32.xlu1 %v948_v51, %s1183_s22  ;;  %299 = vrot.lane.b32.xlu0 %v925_v52, %s1181_s20  ;;  %v211_v52 = vld [vmem:[%s1232_s19 + $0x8] sm:$0xf] }
  0x7a   : > { %449 = vrot.lane.b32.xlu2 %v949_v55, %s1183_s22  ;;  %220 = vst.msk [vmem:[#allocation2 + $0x10] sm:$0xf] %vm217_vm0, %v211_v52 }
  0x7c   : > { %v402_v57 = vpop.permute.xlu2 %401 }
  0x81   : > { %347 = vrot.lane.b32.xlu0 %v932_v58, %s1184_s23  ;;  %349 = vrot.lane.b32.xlu1 %v933_v59, %s1184_s23 }
  0x82   : > { %397 = vrot.lane.b32.xlu2 %v940_v61, %s1185_s24 }
  0x83   : > { %v302_v0 = vpop.permute.xlu1 %301  ;;  %v252_v1 = vpop.permute.xlu0 %251 }
  0x84   : > { %272 = vst.msk [vmem:[#allocation2 + $0x20] sm:$0xf] %vm267_vm1, %v252_v1  ;;  %v523_v6 = vpop.permute.xlu2 %522 }
  0x85   : > { %322 = vst.msk [vmem:[#allocation2 + $0x20] sm:$0xf] %vm317_vm2, %v302_v0 }
  0x89   : > { %399 = vrot.lane.b32.xlu0 %v941_v5, %s1185_s24  ;;  %516 = vrot.lane.b32.xlu1 %v956_v7, %s1186_s25 }
  0x8a   : > { %518 = vrot.lane.b32.xlu2 %v957_v9, %s1186_s25  ;;  %s1060_s25 = sshll.u32 %s1519_s12, 5 }
  0x8b   : > { %v304_v10 = vpop.permute.xlu1 %303  ;;  %v254_v11 = vpop.permute.xlu0 %253  ;;  %s1493_s17 = scalar_lea.vmem %s1511_s3, %s1060_s25 }
  0x8c   : > { %273 = vst.msk [vmem:[#allocation2 + $0x28] sm:$0xf] %vm267_vm1, %v254_v11  ;;  %v294_v12 = vpop.permute.xlu2 %293 }
  0x8d   : > { %323 = vst.msk [vmem:[#allocation2 + $0x28] sm:$0xf] %vm317_vm2, %v304_v10 }
  0x93   : > { %v354_v14 = vpop.permute.xlu1 %353  ;;  %v352_v15 = vpop.permute.xlu0 %351 }
  0x94   : > { %373 = vst.msk [vmem:[#allocation2 + $0x28] sm:$0xf] %vm367_vm5, %v354_v14  ;;  %v446_v18 = vpop.permute.xlu2 %445 }
  0x95   : > { %372 = vst.msk [vmem:[#allocation2 + $0x20] sm:$0xf] %vm367_vm5, %v352_v15  ;;  %v460_v43 = vrot.slane %v446_v18, 4 }
  0x96   : > { %422 = vst.msk [vmem:[#allocation2 + $0x20] sm:$0xf] %vm417_vm7, %v402_v57 }
  0x97   : > { %491 = vst.msk [vmem:[#allocation2 + $0x20] sm:$0xff] %vm1396_vm8, %v472_v17  ;;  %v469_v46 = vsel %vm467_vm6, %v460_v43, %v446_v18 }
  0x9b   : > { %v521_v20 = vpop.permute.xlu1 %520  ;;  %v404_v21 = vpop.permute.xlu0 %403 }
  0x9c   : > { %541 = vst.msk [vmem:[#allocation2 + $0x24] sm:$0xf] %vm536_vm9, %v521_v20  ;;  %v394_v24 = vpop.permute.xlu2 %393 }
  0x9d   : > { %550 = vst.msk [vmem:[#allocation2 + $0x24] sm:$0xf] %vm545_vm10, %v1187_v22 }
  0x9e   : > { %423 = vst.msk [vmem:[#allocation2 + $0x28] sm:$0xf] %vm417_vm7, %v404_v21  ;;  %v980_v28 = vld [vmem:[#allocation2 + $0x20] sm:$0xf] }
  0x9f   : > { %492 = vst.msk [vmem:[#allocation2 + $0x28] sm:$0xff] %vm1396_vm8, %v473_v23 }
  0xa0   : > { %542 = vst.msk [vmem:[#allocation2 + $0x2c] sm:$0xf] %vm536_vm9, %v523_v6 }
  0xa1   : > { %551 = vst.msk [vmem:[#allocation2 + $0x2c] sm:$0xf] %vm545_vm10, %v1187_v22 }
  0xa3   : > { %v246_v25 = vpop.permute.xlu1 %245  ;;  %v244_v26 = vpop.permute.xlu0 %243 }
  0xa4   : > { %269 = vst.msk [vmem:[#allocation2 + $0x8] sm:$0xf] %vm267_vm1, %v246_v25  ;;  %v1065_v31 = vld [vmem:[#allocation2 + $0x24] sm:$0xf]  ;;  %v515_v35 = vpop.permute.xlu2 %514 }
  0xa5   : > { %268 = vst.msk [vmem:[#allocation2] sm:$0xf] %vm267_vm1, %v244_v26 }
  0xa6   : > { %318 = vst.msk [vmem:[#allocation2] sm:$0xf] %vm317_vm2, %v294_v12  ;;  %v1066_v30 = vld [vmem:[#allocation2 + $0x24] sm:$0xf0] }
  0xa7   : > { %v981_v32 = vor.u32 %v1066_v30, %v980_v28 }
  0xa8   : > { %v982_v33 = vld [vmem:[#allocation2 + $0x28] sm:$0xf0] }
  0xa9   : > { %752 = vmatmul.bf16.vlgmr.msra.gmra.mxu2 %v981_v32  ;;  %v985_v34 = vor.u32 %v1065_v31, %v982_v33 }
  0xab   : > { %781 = vmatmul.bf16.vlgmr.msra.gmra.mxu3 %v985_v34  ;;  %v444_v36 = vpop.permute.xlu1 %443  ;;  %v296_v37 = vpop.permute.xlu0 %295 }
  0xac   : > { %319 = vst.msk [vmem:[#allocation2 + $0x8] sm:$0xf] %vm317_vm2, %v296_v37  ;;  %v459_v38 = vrot.slane %v444_v36, 4  ;;  %v306_v41 = vpop.permute.xlu2 %305 }
  0xae   : > { %v468_v42 = vsel %vm467_vm6, %v459_v38, %v444_v36  ;;  %v1156_v36 = vld [vmem:[%s1510_s2] ss:$0 sm:$0xff] }
  0xb3   : > { %v346_v39 = vpop.permute.xlu1 %345  ;;  %v344_v40 = vpop.permute.xlu0 %343 }
  0xb4   : > { %369 = vst.msk [vmem:[#allocation2 + $0x8] sm:$0xf] %vm367_vm5, %v346_v39  ;;  %v458_v47 = vpop.permute.xlu2 %457 }
  0xb5   : > { %368 = vst.msk [vmem:[#allocation2] sm:$0xf] %vm367_vm5, %v344_v40  ;;  %v466_v2 = vrot.slane %v458_v47, 4 }
  0xb6   : > { %418 = vst.msk [vmem:[#allocation2] sm:$0xf] %vm417_vm7, %v394_v24 }
  0xb7   : > { %487 = vst.msk [vmem:[#allocation2] sm:$0xff] %vm1396_vm8, %v468_v42  ;;  %v475_v6 = vsel %vm467_vm6, %v466_v2, %v458_v47 }
  0xbb   : > { %v513_v44 = vpop.permute.xlu1 %512  ;;  %v396_v45 = vpop.permute.xlu0 %395 }
  0xbc   : > { %537 = vst.msk [vmem:[#allocation2 + $0x4] sm:$0xf] %vm536_vm9, %v513_v44  ;;  %v406_v57 = vpop.permute.xlu2 %405 }
  0xbd   : > { %546 = vst.msk [vmem:[#allocation2 + $0x4] sm:$0xf] %vm545_vm10, %v1187_v22 }
  0xbe   : > { %419 = vst.msk [vmem:[#allocation2 + $0x8] sm:$0xf] %vm417_vm7, %v396_v45  ;;  %v964_v51 = vld [vmem:[#allocation2] sm:$0xf] }
  0xbf   : > { %488 = vst.msk [vmem:[#allocation2 + $0x8] sm:$0xff] %vm1396_vm8, %v469_v46 }
  0xc0   : > { %538 = vst.msk [vmem:[#allocation2 + $0xc] sm:$0xf] %vm536_vm9, %v515_v35 }
  0xc1   : > { %547 = vst.msk [vmem:[#allocation2 + $0xc] sm:$0xf] %vm545_vm10, %v1187_v22 }
  0xc3   : > { %v258_v48 = vpop.permute.xlu1 %257  ;;  %v256_v49 = vpop.permute.xlu0 %255 }
  0xc4   : > { %275 = vst.msk [vmem:[#allocation2 + $0x38] sm:$0xf] %vm267_vm1, %v258_v48  ;;  %v1061_v54 = vld [vmem:[#allocation2 + $0x4] sm:$0xf]  ;;  %v527_v62 = vpop.permute.xlu2 %526 }
  0xc5   : > { %274 = vst.msk [vmem:[#allocation2 + $0x30] sm:$0xf] %vm267_vm1, %v256_v49 }
  0xc6   : > { %324 = vst.msk [vmem:[#allocation2 + $0x30] sm:$0xf] %vm317_vm2, %v306_v41  ;;  %v1062_v53 = vld [vmem:[#allocation2 + $0x4] sm:$0xf0] }
  0xc7   : > { %v965_v55 = vor.u32 %v1062_v53, %v964_v51 }
  0xc8   : > { %v966_v56 = vld [vmem:[#allocation2 + $0x8] sm:$0xf0] }
  0xc9   : > { %742 = vmatmul.bf16.vlgmr.msra.gmra.mxu0 %v965_v55  ;;  %v969_v58 = vor.u32 %v1061_v54, %v966_v56 }
  0xcb   : > { %771 = vmatmul.bf16.vlgmr.msra.gmra.mxu1 %v969_v58  ;;  %v456_v59 = vpop.permute.xlu1 %455  ;;  %v308_v60 = vpop.permute.xlu0 %307 }
  0xcc   : > { %325 = vst.msk [vmem:[#allocation2 + $0x38] sm:$0xf] %vm317_vm2, %v308_v60  ;;  %v465_v61 = vrot.slane %v456_v59, 4  ;;  %v298_v5 = vpop.permute.xlu2 %297 }
  0xce   : > { %v474_v1 = vsel %vm467_vm6, %v465_v61, %v456_v59 }
  0xd3   : > { %v358_v63 = vpop.permute.xlu1 %357  ;;  %v356_v0 = vpop.permute.xlu0 %355 }
  0xd4   : > { %375 = vst.msk [vmem:[#allocation2 + $0x38] sm:$0xf] %vm367_vm5, %v358_v63  ;;  %v450_v13 = vpop.permute.xlu2 %449 }
  0xd5   : > { %374 = vst.msk [vmem:[#allocation2 + $0x30] sm:$0xf] %vm367_vm5, %v356_v0  ;;  %v462_v25 = vrot.slane %v450_v13, 4 }
  0xd6   : > { %424 = vst.msk [vmem:[#allocation2 + $0x30] sm:$0xf] %vm417_vm7, %v406_v57 }
  0xd7   : > { %493 = vst.msk [vmem:[#allocation2 + $0x30] sm:$0xff] %vm1396_vm8, %v474_v1  ;;  %v471_v28 = vsel %vm467_vm6, %v462_v25, %v450_v13 }
  0xdb   : > { %v525_v3 = vpop.permute.xlu1 %524  ;;  %v408_v4 = vpop.permute.xlu0 %407 }
  0xdc   : > { %543 = vst.msk [vmem:[#allocation2 + $0x34] sm:$0xf] %vm536_vm9, %v525_v3  ;;  %v398_v20 = vpop.permute.xlu2 %397 }
  0xdd   : > { %552 = vst.msk [vmem:[#allocation2 + $0x34] sm:$0xf] %vm545_vm10, %v1187_v22 }
  0xde   : > { %425 = vst.msk [vmem:[#allocation2 + $0x38] sm:$0xf] %vm417_vm7, %v408_v4  ;;  %v988_v9 = vld [vmem:[#allocation2 + $0x30] sm:$0xf] }
  0xdf   : > { %494 = vst.msk [vmem:[#allocation2 + $0x38] sm:$0xff] %vm1396_vm8, %v475_v6 }
  0xe0   : > { %544 = vst.msk [vmem:[#allocation2 + $0x3c] sm:$0xf] %vm536_vm9, %v527_v62 }
  0xe1   : > { %553 = vst.msk [vmem:[#allocation2 + $0x3c] sm:$0xf] %vm545_vm10, %v1187_v22 }
  0xe3   : > { %v250_v7 = vpop.permute.xlu1 %249  ;;  %v248_v8 = vpop.permute.xlu0 %247 }
  0xe4   : > { %271 = vst.msk [vmem:[#allocation2 + $0x18] sm:$0xf] %vm267_vm1, %v250_v7  ;;  %v1067_v11 = vld [vmem:[#allocation2 + $0x34] sm:$0xf]  ;;  %v519_v27 = vpop.permute.xlu2 %518 }
  0xe5   : > { %270 = vst.msk [vmem:[#allocation2 + $0x10] sm:$0xf] %vm267_vm1, %v248_v8 }
  0xe6   : > { %320 = vst.msk [vmem:[#allocation2 + $0x10] sm:$0xf] %vm317_vm2, %v298_v5  ;;  %v1068_v10 = vld [vmem:[#allocation2 + $0x34] sm:$0xf0] }
  0xe7   : > { %v989_v12 = vor.u32 %v1068_v10, %v988_v9 }
  0xe8   : > { %v990_v14 = vld [vmem:[#allocation2 + $0x38] sm:$0xf0] }
  0xe9   : > { %757 = vmatmul.bf16.gmra.mxu2 %v989_v12  ;;  %v993_v15 = vor.u32 %v1067_v11, %v990_v14 }
  0xeb   : > { %786 = vmatmul.bf16.gmra.mxu3 %v993_v15  ;;  %v448_v17 = vpop.permute.xlu1 %447  ;;  %v300_v18 = vpop.permute.xlu0 %299 }
  0xec   : > { %321 = vst.msk [vmem:[#allocation2 + $0x18] sm:$0xf] %vm317_vm2, %v300_v18  ;;  %v461_v19 = vrot.slane %v448_v17, 4 }
  0xee   : > { %v470_v24 = vsel %vm467_vm6, %v461_v19, %v448_v17 }
  0xf3   : > { %v348_v21 = vpop.permute.xlu0 %347  ;;  %v350_v23 = vpop.permute.xlu1 %349 }
  0xf4   : > { %370 = vst.msk [vmem:[#allocation2 + $0x10] sm:$0xf] %vm367_vm5, %v348_v21 }
  0xf5   : > { %420 = vst.msk [vmem:[#allocation2 + $0x10] sm:$0xf] %vm417_vm7, %v398_v20 }
  0xf6   : > { %489 = vst.msk [vmem:[#allocation2 + $0x10] sm:$0xff] %vm1396_vm8, %v470_v24 }
  0xf7   : > { %371 = vst.msk [vmem:[#allocation2 + $0x18] sm:$0xf] %vm367_vm5, %v350_v23 }
  0xfb   : > { %v400_v26 = vpop.permute.xlu0 %399  ;;  %v517_v29 = vpop.permute.xlu1 %516 }
  0xfc   : > { %421 = vst.msk [vmem:[#allocation2 + $0x18] sm:$0xf] %vm417_vm7, %v400_v26 }
  0xfd   : > { %490 = vst.msk [vmem:[#allocation2 + $0x18] sm:$0xff] %vm1396_vm8, %v471_v28  ;;  %v972_v30 = vld [vmem:[#allocation2 + $0x10] sm:$0xf] }
  0xfe   : > { %540 = vst.msk [vmem:[#allocation2 + $0x1c] sm:$0xf] %vm536_vm9, %v519_v27 }
  0xff   : > { %549 = vst.msk [vmem:[#allocation2 + $0x1c] sm:$0xf] %vm545_vm10, %v1187_v22 }
 0x100   : > { %539 = vst.msk [vmem:[#allocation2 + $0x14] sm:$0xf] %vm536_vm9, %v517_v29 }
 0x101   : > { %548 = vst.msk [vmem:[#allocation2 + $0x14] sm:$0xf] %vm545_vm10, %v1187_v22 }
 0x104   : > { %v1064_v31 = vld [vmem:[#allocation2 + $0x14] sm:$0xf0] }
 0x105   : > { %v973_v32 = vor.u32 %v1064_v31, %v972_v30 }
 0x106   : > { %v974_v33 = vld [vmem:[#allocation2 + $0x18] sm:$0xf0] }
 0x107   : > { %747 = vmatmul.bf16.gmra.mxu0 %v973_v32 }
 0x108   : > { %v1063_v34 = vld [vmem:[#allocation2 + $0x14] sm:$0xf] }
 0x109   : > { %v977_v16 = vor.u32 %v1063_v34, %v974_v33 }
 0x10b   : > { %776 = vmatmul.bf16.gmra.mxu1 %v977_v16 }
 0x12c   : > { %v753_v35 = vpop.f32.mrf.mxu2 }
 0x12d   : > { %v754_v38 = vadd.f32 %v1156_v36, %v753_v35 }
 0x12e   : > { %v782_v37 = vpop.f32.mrf.mxu3 }
 0x12f   : > { %v783_v40 = vadd.f32 %v782_v37, %v754_v38 }
 0x131   : > { %v796_v43 = vmax.f32 %v783_v40, 0.0 }
 0x134   : > { %v755_v39 = vpop.f32.mrf.mxu2 }
 0x135   : > { %v756_v41 = vadd.f32 %v1156_v36, %v755_v39 }
 0x136   : > { %v784_v22 = vpop.f32.mrf.mxu3 }
 0x137   : > { %v785_v42 = vadd.f32 %v784_v22, %v756_v41 }
 0x139   : > { %v797_v44 = vmax.f32 %v785_v42, 0.0 }
 0x13b   : > { %v1098_v45 = vpack.c.bf16 %v797_v44, %v796_v43 }
 0x13d   : > { %1106 = vst [vmem:[%s1493_s17 + $0x10] sm:$0xff] %v1098_v45  }
 0x146   : > { %v743_v46 = vpop.f32.mrf.mxu0 }
 0x147   : > { %v744_v48 = vadd.f32 %v1156_v36, %v743_v46 }
 0x148   : > { %v772_v47 = vpop.f32.mrf.mxu1 }
 0x149   : > { %v773_v50 = vadd.f32 %v772_v47, %v744_v48 }
 0x14b   : > { %v792_v54 = vmax.f32 %v773_v50, 0.0 }
 0x14e   : > { %v745_v49 = vpop.f32.mrf.mxu0 }
 0x14f   : > { %v746_v51 = vadd.f32 %v1156_v36, %v745_v49 }
 0x150   : > { %v774_v52 = vpop.f32.mrf.mxu1 }
 0x151   : > { %v775_v53 = vadd.f32 %v774_v52, %v746_v51 }
 0x153   : > { %v793_v55 = vmax.f32 %v775_v53, 0.0 }
 0x155   : > { %v1088_v56 = vpack.c.bf16 %v793_v55, %v792_v54 }
 0x157   : > { %1089 = vst [vmem:[%s1493_s17] sm:$0xff] %v1088_v56  }
 0x16c   : > { %v758_v57 = vpop.f32.mrf.mxu2 }
 0x16d   : > { %v759_v59 = vadd.f32 %v1156_v36, %v758_v57 }
 0x16e   : > { %v787_v58 = vpop.f32.mrf.mxu3 }
 0x16f   : > { %v788_v61 = vadd.f32 %v787_v58, %v759_v59 }
 0x171   : > { %v798_v1 = vmax.f32 %v788_v61, 0.0 }
 0x174   : > { %v760_v60 = vpop.f32.mrf.mxu2 }
 0x175   : > { %v761_v62 = vadd.f32 %v1156_v36, %v760_v60 }
 0x176   : > { %v789_v63 = vpop.f32.mrf.mxu3 }
 0x177   : > { %v790_v0 = vadd.f32 %v789_v63, %v761_v62 }
 0x179   : > { %v799_v2 = vmax.f32 %v790_v0, 0.0 }
 0x17b   : > { %v1103_v3 = vpack.c.bf16 %v799_v2, %v798_v1 }
 0x17d   : > { %1107 = vst [vmem:[%s1493_s17 + $0x18] sm:$0xff] %v1103_v3  }
 0x184   : > { %v748_v4 = vpop.f32.mrf.mxu0 }
 0x185   : > { %v749_v6 = vadd.f32 %v1156_v36, %v748_v4 }
 0x188   : > { %v777_v5 = vpop.f32.mrf.mxu1 }
 0x189   : > { %v778_v9 = vadd.f32 %v777_v5, %v749_v6 }
 0x18b   : > { %v794_v12 = vmax.f32 %v778_v9, 0.0 }
 0x18c   : > { %v750_v7 = vpop.f32.mrf.mxu0 }
 0x18d   : > { %v751_v8 = vadd.f32 %v1156_v36, %v750_v7 }
 0x190   : > { %v779_v10 = vpop.f32.mrf.mxu1 }
 0x191   : > { %v780_v11 = vadd.f32 %v779_v10, %v751_v8 }
 0x193   : > { %v795_v13 = vmax.f32 %v780_v11, 0.0 }
 0x195   : > { %v1093_v14 = vpack.c.bf16 %v795_v13, %v794_v12 }
 0x197   : > { %1105 = vst [vmem:[%s1493_s17 + $0x8] sm:$0xff] %v1093_v14  }
 0x198 PF: > { %s13_s14 = sadd.s32 1, %s1179_s14   ;;  %s1514_s12 = smov %s1175_s13 }
 0x199   : > { %p10_p5 = scmp.ge.s32.totalorder %s13_s14, 4   ;;  %s1515_s13 = smov %s1517_s15 }
 0x19b   :  { %12 = sbr.rel (!%p10_p5) target bundleno = 2 (0x2), region = 68 }

</bundles_post_ra>
